<compile_context>
chip_gen: v7x
topology: tpu7x:2x2x1
jax: 0.10.0
libtpu: 0.0.40
codegen_flags: <defaults>
</compile_context>

<pallas_src>
import functools

import jax
import jax.numpy as jnp
from jax.experimental import pallas as pl
from jax.experimental.pallas import tpu as pltpu


def _round_up(x, m):
    return ((x + m - 1) // m) * m


# Keep the resident-X buffer small enough that (with double-buffering of the
# other operands) the total stays inside v7x's 32 MiB default scoped VMEM.
_X_RESIDENT_BYTES = 4 * 1024 * 1024


# ----------------------------------------------------------------------------
# Pallas kernel: one SAGEConv layer (mean aggregation), optional fused ReLU
# ----------------------------------------------------------------------------
def _sage_layer_kernel(a_ref, xk_ref, xi_ref, deg_ref, wl_ref, wr_ref, b_ref,
                       o_ref, acc_ref, *, apply_relu, tk, x_resident):
    k = pl.program_id(1)

    @pl.when(k == 0)
    def _():
        acc_ref[...] = jnp.zeros_like(acc_ref)

    # Partial neighbor-sum aggregation: (tm, tk) @ (tk, Din), bf16 MXU -> f32.
    if x_resident:
        # X is fully VMEM-resident; slice the k-th (tk, Din) window in-kernel.
        xk = xk_ref[pl.ds(pl.multiple_of(k * tk, tk), tk), :]
    else:
        xk = xk_ref[...]
    acc_ref[...] += jnp.dot(a_ref[...], xk, preferred_element_type=jnp.float32)

    @pl.when(k == pl.num_programs(1) - 1)
    def _():
        # Mean normalization fused here (f32 deg_inv, broadcast over lanes).
        agg = (acc_ref[...] * deg_ref[...]).astype(jnp.bfloat16)
        # Two MXU matmuls (no in-kernel concatenate), f32 accumulation.
        h = jnp.dot(agg, wl_ref[...], preferred_element_type=jnp.float32)
        h = h + jnp.dot(xi_ref[...], wr_ref[...],
                        preferred_element_type=jnp.float32)
        h = h + b_ref[...]
        if apply_relu:
            h = jnp.maximum(h, 0.0)          # f32 VPU path (v5e-safe)
        o_ref[...] = h.astype(o_ref.dtype)


def sage_layer(a, deg_inv, x_k, x_row, wl, wr, b, *,
               apply_relu, out_dtype=jnp.float32, tm=512, tk=2048):
    """One SAGEConv layer on TPU via Pallas (rows of A may be a subset).

    a       : (M, N)      raw neighbor-count matrix rows (bf16-castable)
    deg_inv : (M, 1)      f32 reciprocal in-degree (1 for isolated nodes)
    x_k     : (N, Din)    node features for the neighbor (aggregation) path
    x_row   : (M, Din)    node features for the root path (lin_r)
    wl, wr  : (Din, Dout) lin_l / lin_r weights
    b       : (1, Dout)   lin_l bias
    """
    m, n = a.shape
    din = x_k.shape[1]
    dout = wl.shape[1]

    f32, bf16 = jnp.float32, jnp.bfloat16

    # Lane-dense feature / output dims (multiples of 128).
    din_p = _round_up(din, 128)
    dout_p = _round_up(dout, 128)

    # Row tile: multiple of 16 (bf16 sublane packing); keep >= 2 row tiles when
    # possible so dimension_semantics="parallel" can split rows across the two
    # v7x TensorCores.
    tm = _round_up(min(tm, _round_up(m, 16)), 16)
    if _round_up(m, tm) // tm < 2 and tm >= 32:
        tm = _round_up(tm // 2, 16)
    m_p = _round_up(m, tm)

    # Reduction tile over the aggregation dim (lane axis of A).
    tk = _round_up(min(tk, _round_up(n, 128)), 128)
    n_p = _round_up(n, tk)

    # Keep X fully VMEM-resident (no re-streaming per row tile) when it fits.
    x_resident = (n_p * din_p * 2) <= _X_RESIDENT_BYTES

    # Zero-pad and cast MXU operands to bf16 (accumulation stays f32 in-kernel).
    # Row dim and reduction dim are padded independently (no lcm blowup).
    a_p = jnp.zeros((m_p, n_p), bf16).at[:m, :n].set(a.astype(bf16))
    xk_p = jnp.zeros((n_p, din_p), bf16).at[:n, :din].set(x_k.astype(bf16))
    xi_p = jnp.zeros((m_p, din_p), bf16).at[:m, :din].set(x_row.astype(bf16))
    deg_p = jnp.zeros((m_p, 1), f32).at[:m, :].set(deg_inv.astype(f32))
    wl_p = jnp.zeros((din_p, dout_p), bf16).at[:din, :dout].set(wl.astype(bf16))
    wr_p = jnp.zeros((din_p, dout_p), bf16).at[:din, :dout].set(wr.astype(bf16))
    b_p = jnp.zeros((1, dout_p), f32).at[:, :dout].set(b.astype(f32))

    grid = (m_p // tm, n_p // tk)
    kernel = functools.partial(_sage_layer_kernel, apply_relu=apply_relu,
                               tk=tk, x_resident=x_resident)

    if x_resident:
        xk_spec = pl.BlockSpec((n_p, din_p), lambda i, k: (0, 0))
    else:
        xk_spec = pl.BlockSpec((tk, din_p), lambda i, k: (k, 0))

    out = pl.pallas_call(
        kernel,
        out_shape=jax.ShapeDtypeStruct((m_p, dout_p), out_dtype),
        grid=grid,
        in_specs=[
            pl.BlockSpec((tm, tk), lambda i, k: (i, k)),             # A counts tile
            xk_spec,                                                 # X (neighbor/k path)
            pl.BlockSpec((tm, din_p), lambda i, k: (i, 0)),          # X (root/row path)
            pl.BlockSpec((tm, 1), lambda i, k: (i, 0)),              # deg_inv (f32)
            pl.BlockSpec((din_p, dout_p), lambda i, k: (0, 0)),      # Wl
            pl.BlockSpec((din_p, dout_p), lambda i, k: (0, 0)),      # Wr
            pl.BlockSpec((1, dout_p), lambda i, k: (0, 0)),          # bias
        ],
        out_specs=pl.BlockSpec((tm, dout_p), lambda i, k: (i, 0)),
        scratch_shapes=[pltpu.VMEM((tm, din_p), f32)],
        compiler_params=pltpu.CompilerParams(
            dimension_semantics=("parallel", "arbitrary")),
    )(a_p, xk_p, xi_p, deg_p, wl_p, wr_p, b_p)

    return out[:m, :dout]


# ----------------------------------------------------------------------------
# Glue: raw neighbor-count matrix + 1/deg from edge_index (mean aggregation)
# ----------------------------------------------------------------------------
def build_adjacency(edge_index, num_nodes):
    # Messages flow src -> dst (PyG convention: mean over incoming messages,
    # duplicates counted; isolated nodes aggregate to zero).  Counts are
    # accumulated in f32 (exact) and cast once to bf16; normalization (1/deg,
    # kept f32) is fused into the kernel epilogue.
    # TODO(synk): for large sparse graphs replace this dense O(N^2) C and the
    # C@X stage with an edge/CSR segment-sum Pallas kernel (scalar-prefetched
    # row offsets + manual DMA gather of X rows); dense C keeps the hot path
    # on the MXU for small/medium graphs.
    src, dst = edge_index[0], edge_index[1]
    counts = jnp.zeros((num_nodes, num_nodes), jnp.float32).at[dst, src].add(1.0)
    deg = counts.sum(axis=1, keepdims=True)
    deg_inv = 1.0 / jnp.maximum(deg, 1.0)
    return counts.astype(jnp.bfloat16), deg_inv


# ----------------------------------------------------------------------------
# GCN module (forward only), parameters initialized deterministically
# ----------------------------------------------------------------------------
class GCNPallas:
    def __init__(self, input_dim=128, layer_num=1, hidden=128, class_num=2, seed=0):
        self.layer_num = layer_num
        key = jax.random.PRNGKey(seed)

        def linear_init(k, din, dout):
            k1, k2 = jax.random.split(k)
            lim = 1.0 / jnp.sqrt(din)
            w = jax.random.uniform(k1, (din, dout), jnp.float32, -lim, lim)
            b = jax.random.uniform(k2, (1, dout), jnp.float32, -lim, lim)
            return w, b

        self.convs = []
        dims_in = [input_dim] + [hidden] * (layer_num - 1)
        for din in dims_in:
            key, k1, k2 = jax.random.split(key, 3)
            wl, bl = linear_init(k1, din, hidden)
            wr, _ = linear_init(k2, din, hidden)   # lin_r has no bias in PyG SAGEConv
            self.convs.append((wl, wr, bl))

        key, k1, k2 = jax.random.split(key, 3)
        wl, bl = linear_init(k1, hidden, class_num)
        wr, _ = linear_init(k2, hidden, class_num)
        self.classifier = (wl, wr, bl)
        # TODO(synk): BatchNorm1d layers exist in the PyTorch __init__ but are
        # never used in forward(), so they are intentionally not implemented.

    def __call__(self, x, edge_index, ptr):
        n = x.shape[0]
        a, deg_inv = build_adjacency(edge_index, n)

        h = x
        for (wl, wr, bl) in self.convs:
            # Hidden layers emit bf16 directly (feeds the next MXU pass).
            h = sage_layer(a, deg_inv, h, h, wl, wr, bl,
                           apply_relu=True, out_dtype=jnp.bfloat16)

        # 'first' pooling fused into the classifier: only the pooled rows of
        # the final SAGEConv are computed (A rows / deg / root features are
        # gathered up front; the neighbor path still sees all node features).
        pool_idx = ptr[:-1]
        a_rows = a[pool_idx]
        deg_rows = deg_inv[pool_idx]
        h_rows = h[pool_idx]
        wl, wr, bl = self.classifier
        return sage_layer(a_rows, deg_rows, h, h_rows, wl, wr, bl,
                          apply_relu=False, out_dtype=jnp.float32)


# ----------------------------------------------------------------------------
# Pure-JAX reference mirroring the kernel math (bf16 MXU inputs, f32 accumulate)
# ----------------------------------------------------------------------------
def reference_forward(model, x, edge_index, ptr):
    n = x.shape[0]
    a, deg_inv = build_adjacency(edge_index, n)
    bf16, f32 = jnp.bfloat16, jnp.float32

    def layer(a_rows, dinv_rows, h_k, h_row, wl, wr, b, relu):
        agg = jnp.dot(a_rows, h_k.astype(bf16),
                      preferred_element_type=f32) * dinv_rows
        out = jnp.dot(agg.astype(bf16), wl.astype(bf16),
                      preferred_element_type=f32)
        out = out + jnp.dot(h_row.astype(bf16), wr.astype(bf16),
                            preferred_element_type=f32)
        out = out + b
        return jnp.maximum(out, 0.0) if relu else out

    h = x
    for (wl, wr, bl) in model.convs:
        h = layer(a, deg_inv, h, h, wl, wr, bl, True).astype(bf16)

    idx = ptr[:-1]
    wl, wr, bl = model.classifier
    return layer(a[idx], deg_inv[idx], h, h[idx], wl, wr, bl, False)


if __name__ == "__main__":
    key = jax.random.PRNGKey(0)

    # Small synthetic batch: 2 graphs, 8 nodes each (16 nodes total), 128 features.
    num_nodes, input_dim, hidden, class_num = 16, 128, 128, 2
    kx, ke = jax.random.split(key)
    x = jax.random.normal(kx, (num_nodes, input_dim), jnp.float32)

    # Random directed edges kept within each graph of the batch.
    edges_per_graph = 20
    e0 = jax.random.randint(ke, (2, edges_per_graph), 0, 8)              # graph 0: nodes 0..7
    e1 = jax.random.randint(jax.random.fold_in(ke, 1),
                            (2, edges_per_graph), 0, 8) + 8              # graph 1: nodes 8..15
    edge_index = jnp.concatenate([e0, e1], axis=1).astype(jnp.int32)
    ptr = jnp.array([0, 8, 16], jnp.int32)

    model = GCNPallas(input_dim=input_dim, layer_num=1, hidden=hidden,
                      class_num=class_num, seed=0)

    out = model(x, edge_index, ptr)
    out = jax.block_until_ready(out)

    ref = reference_forward(model, x, edge_index, ptr)
    assert out.shape == (2, class_num), out.shape
    assert jnp.allclose(out, ref, atol=1e-2, rtol=1e-2), (out, ref)

    print("KERNEL_OK")
</pallas_src>

<mosaic_0001>
module attributes {stable_mosaic.version = 11 : i64} {
  func.func @_sage_layer_kernel(%arg0: i32, %arg1: i32, %arg2: memref<16x128xbf16, #tpu.memory_space<vmem>>, %arg3: memref<128x128xbf16, #tpu.memory_space<vmem>>, %arg4: memref<16x128xbf16, #tpu.memory_space<vmem>>, %arg5: memref<16x1xf32, #tpu.memory_space<vmem>>, %arg6: memref<128x128xbf16, #tpu.memory_space<vmem>>, %arg7: memref<128x128xbf16, #tpu.memory_space<vmem>>, %arg8: memref<1x128xf32, #tpu.memory_space<vmem>>, %arg9: memref<16x128xbf16, #tpu.memory_space<vmem>>, %arg10: memref<16x128xf32, #tpu.memory_space<vmem>>) attributes {dimension_semantics = [#tpu.dimension_semantics<parallel>, #tpu.dimension_semantics<arbitrary>], iteration_bounds = array<i64: 1, 1>, scalar_prefetch = 0 : i64, scratch_operands = 1 : i64, tpu.core_type = #tpu.core_type<tc>, window_params = [{transform_indices = @transform_0, window_bounds = array<i64: 16, 128>}, {pipeline_mode = #tpu.pipeline_mode<synchronous>, transform_indices = @transform_1, window_bounds = array<i64: 128, 128>}, {transform_indices = @transform_2, window_bounds = array<i64: 16, 128>}, {transform_indices = @transform_3, window_bounds = array<i64: 16, 1>}, {pipeline_mode = #tpu.pipeline_mode<synchronous>, transform_indices = @transform_4, window_bounds = array<i64: 128, 128>}, {pipeline_mode = #tpu.pipeline_mode<synchronous>, transform_indices = @transform_5, window_bounds = array<i64: 128, 128>}, {pipeline_mode = #tpu.pipeline_mode<synchronous>, transform_indices = @transform_6, window_bounds = array<i64: 1, 128>}, {transform_indices = @transform_7, window_bounds = array<i64: 16, 128>}]} {
    %c0_i32 = arith.constant 0 : i32
    %0 = arith.cmpi eq, %arg1, %c0_i32 : i32
    %1 = arith.extui %0 : i1 to i32
    %c0_i32_0 = arith.constant 0 : i32
    %2 = arith.cmpi ne, %1, %c0_i32_0 : i32
    scf.if %2 {
      %cst_9 = arith.constant 0.000000e+00 : f32
      %15 = vector.broadcast %cst_9 : f32 to vector<16x128xf32>
      %c0_10 = arith.constant 0 : index
      %c0_11 = arith.constant 0 : index
      %16 = vector.load %arg10[%c0_10, %c0_11] : memref<16x128xf32, #tpu.memory_space<vmem>>, vector<16x128xf32>
      tpu.vector_store %arg10[%c0_10, %c0_11], %15 {strides = array<i32>} : memref<16x128xf32, #tpu.memory_space<vmem>>, vector<16x128xf32>,
    } else {
    }
    %c128_i32 = arith.constant 128 : i32
    %3 = arith.muli %arg1, %c128_i32 : i32
    %4 = tpu.assume_multiple %3, 128 : i32
    %5 = arith.index_cast %4 : i32 to index
    %c0 = arith.constant 0 : index
    %6 = vector.load %arg3[%5, %c0] : memref<128x128xbf16, #tpu.memory_space<vmem>>, vector<128x128xbf16>
    %c0_1 = arith.constant 0 : index
    %c0_2 = arith.constant 0 : index
    %7 = vector.load %arg10[%c0_1, %c0_2] : memref<16x128xf32, #tpu.memory_space<vmem>>, vector<16x128xf32>
    %c0_3 = arith.constant 0 : index
    %c0_4 = arith.constant 0 : index
    %8 = vector.load %arg2[%c0_3, %c0_4] : memref<16x128xbf16, #tpu.memory_space<vmem>>, vector<16x128xbf16>
    %cst = arith.constant dense<0.000000e+00> : vector<16x128xf32>
    %9 = tpu.matmul %8, %6, %cst {dimension_numbers = #tpu.dot_dimension_numbers<[1], [0], [0], [1], [0, 0, 1, 1], [], []>} : vector<16x128xbf16>, vector<128x128xbf16>, vector<16x128xf32> -> vector<16x128xf32>
    %10 = arith.addf %7, %9 : vector<16x128xf32>
    %c0_5 = arith.constant 0 : index
    %c0_6 = arith.constant 0 : index
    %11 = vector.load %arg10[%c0_5, %c0_6] : memref<16x128xf32, #tpu.memory_space<vmem>>, vector<16x128xf32>
    tpu.vector_store %arg10[%c0_5, %c0_6], %10 {strides = array<i32>} : memref<16x128xf32, #tpu.memory_space<vmem>>, vector<16x128xf32>,
    %c0_i32_7 = arith.constant 0 : i32
    %12 = arith.cmpi eq, %arg1, %c0_i32_7 : i32
    %13 = arith.extui %12 : i1 to i32
    %c0_i32_8 = arith.constant 0 : i32
    %14 = arith.cmpi ne, %13, %c0_i32_8 : i32
    scf.if %14 {
      %c0_9 = arith.constant 0 : index
      %c0_10 = arith.constant 0 : index
      %15 = vector.load %arg10[%c0_9, %c0_10] : memref<16x128xf32, #tpu.memory_space<vmem>>, vector<16x128xf32>
      %c0_11 = arith.constant 0 : index
      %c0_12 = arith.constant 0 : index
      %16 = vector.load %arg5[%c0_11, %c0_12] : memref<16x1xf32, #tpu.memory_space<vmem>>, vector<16x1xf32>
      %17 = vector.broadcast %16 : vector<16x1xf32> to vector<16x128xf32>
      %18 = arith.mulf %15, %17 : vector<16x128xf32>
      %19 = arith.truncf %18 : vector<16x128xf32> to vector<16x128xbf16>
      %c0_13 = arith.constant 0 : index
      %c0_14 = arith.constant 0 : index
      %20 = vector.load %arg6[%c0_13, %c0_14] : memref<128x128xbf16, #tpu.memory_space<vmem>>, vector<128x128xbf16>
      %cst_15 = arith.constant dense<0.000000e+00> : vector<16x128xf32>
      %21 = tpu.matmul %19, %20, %cst_15 {dimension_numbers = #tpu.dot_dimension_numbers<[1], [0], [0], [1], [0, 0, 1, 1], [], []>} : vector<16x128xbf16>, vector<128x128xbf16>, vector<16x128xf32> -> vector<16x128xf32>
      %c0_16 = arith.constant 0 : index
      %c0_17 = arith.constant 0 : index
      %22 = vector.load %arg4[%c0_16, %c0_17] : memref<16x128xbf16, #tpu.memory_space<vmem>>, vector<16x128xbf16>
      %c0_18 = arith.constant 0 : index
      %c0_19 = arith.constant 0 : index
      %23 = vector.load %arg7[%c0_18, %c0_19] : memref<128x128xbf16, #tpu.memory_space<vmem>>, vector<128x128xbf16>
      %cst_20 = arith.constant dense<0.000000e+00> : vector<16x128xf32>
      %24 = tpu.matmul %22, %23, %cst_20 {dimension_numbers = #tpu.dot_dimension_numbers<[1], [0], [0], [1], [0, 0, 1, 1], [], []>} : vector<16x128xbf16>, vector<128x128xbf16>, vector<16x128xf32> -> vector<16x128xf32>
      %25 = arith.addf %21, %24 : vector<16x128xf32>
      %c0_21 = arith.constant 0 : index
      %c0_22 = arith.constant 0 : index
      %26 = vector.load %arg8[%c0_21, %c0_22] : memref<1x128xf32, #tpu.memory_space<vmem>>, vector<1x128xf32>
      %27 = vector.broadcast %26 : vector<1x128xf32> to vector<16x128xf32>
      %28 = arith.addf %25, %27 : vector<16x128xf32>
      %cst_23 = arith.constant 0.000000e+00 : f32
      %29 = vector.broadcast %cst_23 : f32 to vector<16x128xf32>
      %30 = arith.maximumf %28, %29 : vector<16x128xf32>
      %31 = arith.truncf %30 : vector<16x128xf32> to vector<16x128xbf16>
      %c0_24 = arith.constant 0 : index
      %c0_25 = arith.constant 0 : index
      %32 = vector.load %arg9[%c0_24, %c0_25] : memref<16x128xbf16, #tpu.memory_space<vmem>>, vector<16x128xbf16>
      tpu.vector_store %arg9[%c0_24, %c0_25], %31 {strides = array<i32>} : memref<16x128xbf16, #tpu.memory_space<vmem>>, vector<16x128xbf16>,
    } else {
    }
    return
  }
  func.func @transform_0(%arg0: i32, %arg1: i32) -> (i32, i32) {
    %c0_i32 = arith.constant 0 : i32
    return %arg0, %arg1 : i32, i32
  }
  func.func @transform_1(%arg0: i32, %arg1: i32) -> (i32, i32) {
    %c0_i32 = arith.constant 0 : i32
    %c0_i32_0 = arith.constant 0 : i32
    %c0_i32_1 = arith.constant 0 : i32
    return %c0_i32, %c0_i32_0 : i32, i32
  }
  func.func @transform_2(%arg0: i32, %arg1: i32) -> (i32, i32) {
    %c0_i32 = arith.constant 0 : i32
    %c0_i32_0 = arith.constant 0 : i32
    return %arg0, %c0_i32 : i32, i32
  }
  func.func @transform_3(%arg0: i32, %arg1: i32) -> (i32, i32) {
    %c0_i32 = arith.constant 0 : i32
    %c0_i32_0 = arith.constant 0 : i32
    return %arg0, %c0_i32 : i32, i32
  }
  func.func @transform_4(%arg0: i32, %arg1: i32) -> (i32, i32) {
    %c0_i32 = arith.constant 0 : i32
    %c0_i32_0 = arith.constant 0 : i32
    %c0_i32_1 = arith.constant 0 : i32
    return %c0_i32, %c0_i32_0 : i32, i32
  }
  func.func @transform_5(%arg0: i32, %arg1: i32) -> (i32, i32) {
    %c0_i32 = arith.constant 0 : i32
    %c0_i32_0 = arith.constant 0 : i32
    %c0_i32_1 = arith.constant 0 : i32
    return %c0_i32, %c0_i32_0 : i32, i32
  }
  func.func @transform_6(%arg0: i32, %arg1: i32) -> (i32, i32) {
    %c0_i32 = arith.constant 0 : i32
    %c0_i32_0 = arith.constant 0 : i32
    %c0_i32_1 = arith.constant 0 : i32
    return %c0_i32, %c0_i32_0 : i32, i32
  }
  func.func @transform_7(%arg0: i32, %arg1: i32) -> (i32, i32) {
    %c0_i32 = arith.constant 0 : i32
    %c0_i32_0 = arith.constant 0 : i32
    return %arg0, %c0_i32 : i32, i32
  }
}

</mosaic_0001>

<bundles_post_ra>
// kernel: tpu_custom_call.1
= control target key start
LH: loop header
LB: loop body
LE: loop exit
PB: predicated region body
PF: predicated region fallthrough
CT: control target
= control target key end

     0   :  { %12 = vsyncpa [#allocation4], 0  ;;  %s892_s0 = inlined_call_operand.vmem [shape: bf16[16,128], index: 0, kind: input, shape index: {}]   ;;  %s893_s1 = inlined_call_operand.hbm [shape: bf16[128,128], index: 1, kind: input, shape index: {}]   ;;  %s894_s2 = inlined_call_operand.vmem [shape: bf16[16,128], index: 2, kind: input, shape index: {}]   ;;  %s895_s3 = inlined_call_operand.vmem [shape: f32[16,1], index: 3, kind: input, shape index: {}]   ;;  %s896_s4 = inlined_call_operand.hbm [shape: bf16[128,128], index: 4, kind: input, shape index: {}]   ;;  %s897_s5 = inlined_call_operand.hbm [shape: bf16[128,128], index: 5, kind: input, shape index: {}]   ;;  %s898_s6 = inlined_call_operand.vmem [shape: f32[1,128], index: 6, kind: input, shape index: {}]   ;;  %s899_s7 = inlined_call_operand.hbm [shape: bf16[16,128], index: 7, kind: output, shape index: {}]  }
   0x1   :  { %13 = vsyncpa [#allocation7], 0 }
   0x2   :  { %14 = vsyncpa [#allocation5], 0  ;;  %s731_s24 = smov [#allocation6]   ;;  %s732_s26 = smov [#allocation3]  }
   0x3   :  { %s38_s25 = sshll.u32 %s731_s24, 4  ;;  %s22_s27 = sshll.u32 %s732_s26, 4  ;;  %s39_s25 = int_to_ptr.vmem [resolvable:$true] %s38_s25  ;;  %s780_s27 = int_to_ptr.vmem [resolvable:$true] %s22_s27 }
   0x4   :  { %s637_s30 = scalar_lea.hbm %s896_s4, 1024 }
   0x5   :  { %p638_p0 = scmp.ne.s32.totalorder %s896_s4, %s637_s30  ;;  %p641_p1 = scmp.lt.u32.totalorder %s637_s30, %s896_s4 }
   0x7   :  { %p643_p2 = pnand %p641_p1, %p638_p0 }
   0x9   :  { %646 = shalt.err (!%p643_p2)
}
   0xa   :  { %s647_s12 = scalar_lea.vmem %s39_s25, 1024  ;;  %p652_p4 = scmp.lt.s32.totalorder %s39_s25, %s39_s25 }
   0xb   :  { %p648_p3 = scmp.ne.s32.totalorder %s39_s25, %s647_s12  ;;  %p653_p5 = scmp.lt.s32.totalorder %s647_s12, %s647_s12 }
   0xd   :  { %p654_p6 = por %p653_p5, %p652_p4 }
   0xf   :  { %p655_p7 = pnand %p654_p6, %p648_p3 }
  0x11   :  { %658 = shalt.err (!%p655_p7)
}
  0x12   :  { %s733_s13 = smov 64   ;;  %s734_s14 = smov 4  }
  0x13   :  { %44 = dma.hbm_to_vmem [thread:$0]  %s896_s4, 1024, %s39_s25, [#allocation7], %s733_s13, %s733_s13, %s734_s14  }
  0x14   :  { %s659_s19 = scalar_lea.hbm %s893_s1, 1024 }
  0x15   :  { %p660_p8 = scmp.ne.s32.totalorder %s893_s1, %s659_s19  ;;  %p663_p9 = scmp.lt.u32.totalorder %s659_s19, %s893_s1 }
  0x17   :  { %p665_p10 = pnand %p663_p9, %p660_p8 }
  0x19   :  { %668 = shalt.err (!%p665_p10)
}
  0x1a   :  { %s669_s24 = scalar_lea.vmem %s780_s27, 1024  ;;  %p674_p12 = scmp.lt.s32.totalorder %s780_s27, %s780_s27 }
  0x1b   :  { %p670_p11 = scmp.ne.s32.totalorder %s780_s27, %s669_s24  ;;  %p675_p13 = scmp.lt.s32.totalorder %s669_s24, %s669_s24 }
  0x1d   :  { %p676_p0 = por %p675_p13, %p674_p12 }
  0x1f   :  { %p677_p1 = pnand %p676_p0, %p670_p11 }
  0x21   :  { %680 = shalt.err (!%p677_p1)
}
  0x22   :  { %28 = dma.hbm_to_vmem [thread:$0]  %s893_s1, 1024, %s780_s27, [#allocation4], %s733_s13, %s733_s13, %s734_s14  }
  0x23   :  { %s735_s26 = smov [#allocation8]   ;;  %s681_s8 = scalar_lea.hbm %s897_s5, 1024 }
  0x24   :  { %s50_s28 = sshll.u32 %s735_s26, 4  ;;  %p682_p2 = scmp.ne.s32.totalorder %s897_s5, %s681_s8  ;;  %s51_s28 = int_to_ptr.vmem [resolvable:$true] %s50_s28 }
  0x25   :  { %p685_p3 = scmp.lt.u32.totalorder %s681_s8, %s897_s5 }
  0x27   :  { %p687_p4 = pnand %p685_p3, %p682_p2 }
  0x29   :  { %690 = shalt.err (!%p687_p4)
}
  0x2a   :  { %s691_s15 = scalar_lea.vmem %s51_s28, 1024  ;;  %p696_p6 = scmp.lt.s32.totalorder %s51_s28, %s51_s28 }
  0x2b   :  { %p692_p5 = scmp.ne.s32.totalorder %s51_s28, %s691_s15  ;;  %p697_p7 = scmp.lt.s32.totalorder %s691_s15, %s691_s15 }
  0x2d   :  { %p698_p8 = por %p697_p7, %p696_p6 }
  0x2f   :  { %p699_p9 = pnand %p698_p8, %p692_p5 }
  0x31   :  { %702 = shalt.err (!%p699_p9)
}
  0x32   :  { %56 = dma.hbm_to_vmem [thread:$0]  %s897_s5, 1024, %s51_s28, [#allocation7], %s733_s13, %s733_s13, %s734_s14  }
  0x33   :  { %725 = dma.done.wait [#allocation4], 1024  }
  0x34   :  { %726 = vsyncadd [#allocation4], 4294966272 }
  0x35   :  { %727 = dma.done.wait [#allocation7], 2048  }
  0x36   :  { %728 = vsyncadd [#allocation7], 4294965248  ;;  %v736_v0 = vmov 0.0   ;;  %vm737_vm0 = vmmov 0   ;;  %v738_v1 = vmov 0   ;;  %v611_v2 = vld [vmem:[#allocation3] sm:$0xff]  }
  0x37   :  { %541 = vmatprep.subr.bf16.mxu0 %v736_v0  ;;  %557 = vmatprep.mubr.msk.bf16.mxu0 %vm737_vm0, %v736_v0  ;;  %v612_v3 = vld [vmem:[#allocation3 + $0x8] sm:$0xff]   ;;  %v613_v4 = vld [vmem:[#allocation3 + $0x10] sm:$0xff]   ;;  %v614_v5 = vld [vmem:[#allocation3 + $0x18] sm:$0xff]   ;;  %s739_s22 = smov [#allocation9]  }
  0x38   :  { %610 = vset.pattern.permute.xlu0 %v738_v1  ;;  %561 = vmatprep.subr.bf16.mxu1 %v736_v0  ;;  %v204_v6 = vld [vmem:[%s895_s3] sm:$0xff]  ;;  %v205_v8 = vld [vmem:[%s895_s3 + $0x8] sm:$0xff]  ;;  %v624_v11 = vld [vmem:[#allocation8 + $0x10] sm:$0xff]   ;;  %s463_s23 = sshll.u32 %s739_s22, 4  ;;  %s464_s23 = int_to_ptr.vmem [resolvable:$true] %s463_s23 }
  0x39   :  { %577 = vmatprep.mubr.msk.bf16.mxu1 %vm737_vm0, %v736_v0  ;;  %542 = vmatpush3.bf16.msra.mxu0 %v611_v2  ;;  %v620_v7 = vld [vmem:[#allocation8] sm:$0xff]   ;;  %v622_v9 = vld [vmem:[#allocation8 + $0x8] sm:$0xff]   ;;  %v626_v13 = vld [vmem:[#allocation8 + $0x18] sm:$0xff]   ;;  %s703_s24 = scalar_lea.vmem %s464_s23, 128  ;;  %p708_p11 = scmp.lt.s32.totalorder %s464_s23, %s464_s23 }
  0x3a   :  { %543 = vmatprep.subr.bf16.mxu0 %v736_v0  ;;  %208 = vperm.xlu0 %610, %v204_v6   ;;  %v615_v10 = vld [vmem:[#allocation3 + $0x20] sm:$0xff]   ;;  %v616_v12 = vld [vmem:[#allocation3 + $0x28] sm:$0xff]   ;;  %v617_v14 = vld [vmem:[#allocation3 + $0x30] sm:$0xff]   ;;  %p704_p10 = scmp.ne.s32.totalorder %s464_s23, %s703_s24  ;;  %p709_p12 = scmp.lt.s32.totalorder %s703_s24, %s703_s24 }
  0x3b   :  { %562 = vmatpush3.bf16.msra.mxu1 %v620_v7  ;;  %v628_v15 = vld [vmem:[#allocation8 + $0x20] sm:$0xff]   ;;  %v618_v16 = vld [vmem:[#allocation3 + $0x38] sm:$0xff]   ;;  %v630_v17 = vld [vmem:[#allocation8 + $0x28] sm:$0xff]  }
  0x3c   :  { %563 = vmatprep.subr.bf16.mxu1 %v736_v0  ;;  %v619_v18 = vld [vmem:[%s892_s0] sm:$0xff]   ;;  %v632_v20 = vld [vmem:[#allocation8 + $0x30] sm:$0xff]   ;;  %v623_v21 = vld [vmem:[#allocation6 + $0x8] sm:$0xff]   ;;  %p710_p13 = por %p709_p12, %p708_p11 }
  0x3d   :  { %544 = vmatpush3.bf16.msra.mxu0 %v612_v3  ;;  %v621_v19 = vld [vmem:[#allocation6] sm:$0xff]   ;;  %v625_v22 = vld [vmem:[#allocation6 + $0x10] sm:$0xff]   ;;  %v627_v23 = vld [vmem:[#allocation6 + $0x18] sm:$0xff]  }
  0x3e   :  { %545 = vmatprep.subr.bf16.mxu0 %v736_v0  ;;  %213 = vperm.xlu0 %610, %v205_v8   ;;  %v629_v24 = vld [vmem:[#allocation6 + $0x20] sm:$0xff]   ;;  %v631_v25 = vld [vmem:[#allocation6 + $0x28] sm:$0xff]   ;;  %v633_v26 = vld [vmem:[#allocation6 + $0x30] sm:$0xff]   ;;  %p711_p0 = pnand %p710_p13, %p704_p10 }
  0x3f   :  { %564 = vmatpush3.bf16.msra.mxu1 %v622_v9  ;;  %v634_v27 = vld [vmem:[#allocation8 + $0x38] sm:$0xff]   ;;  %v635_v28 = vld [vmem:[%s894_s2] sm:$0xff]  }
  0x40   :  { %565 = vmatprep.subr.bf16.mxu1 %v736_v0  ;;  %v636_v29 = vld [vmem:[#allocation6 + $0x38] sm:$0xff]   ;;  %v504_v44 = vld [vmem:[%s898_s6] ss:$0 sm:$0xff] }
  0x41   :  { %546 = vmatpush3.bf16.msra.mxu0 %v613_v4 }
  0x42   :  { %547 = vmatprep.subr.bf16.mxu0 %v736_v0 }
  0x43   :  { %566 = vmatpush3.bf16.msra.mxu1 %v624_v11 }
  0x44   :  { %567 = vmatprep.subr.bf16.mxu1 %v736_v0 }
  0x45   :  { %548 = vmatpush3.bf16.msra.mxu0 %v614_v5 }
  0x46   :  { %549 = vmatprep.subr.bf16.mxu0 %v736_v0 }
  0x47   :  { %568 = vmatpush3.bf16.msra.mxu1 %v626_v13 }
  0x48   :  { %569 = vmatprep.subr.bf16.mxu1 %v736_v0 }
  0x49   :  { %550 = vmatpush3.bf16.msra.mxu0 %v615_v10 }
  0x4a   :  { %551 = vmatprep.subr.bf16.mxu0 %v736_v0 }
  0x4b   :  { %570 = vmatpush3.bf16.msra.mxu1 %v628_v15 }
  0x4c   :  { %571 = vmatprep.subr.bf16.mxu1 %v736_v0 }
  0x4d   :  { %552 = vmatpush3.bf16.msra.mxu0 %v616_v12 }
  0x4e   :  { %553 = vmatprep.subr.bf16.mxu0 %v736_v0 }
  0x4f   :  { %572 = vmatpush3.bf16.msra.mxu1 %v630_v17 }
  0x50   :  { %573 = vmatprep.subr.bf16.mxu1 %v736_v0 }
  0x51   :  { %554 = vmatpush3.bf16.msra.mxu0 %v617_v14 }
  0x52   :  { %555 = vmatprep.subr.bf16.mxu0 %v736_v0 }
  0x53   :  { %574 = vmatpush3.bf16.msra.mxu1 %v632_v20 }
  0x54   :  { %575 = vmatprep.subr.bf16.mxu1 %v736_v0 }
  0x55   :  { %556 = vmatpush3.bf16.msra.mxu0 %v618_v16 }
  0x56   :  { %581 = vmatprep.subr.bf16.mxu0 %v736_v0 }
  0x57   :  { %576 = vmatpush3.bf16.msra.mxu1 %v634_v27 }
  0x58   :  { %558 = vmatmul.mubr.bf16.vlgmr.msra.gmra.mrb[0].mxu0 %v619_v18 }
  0x59   :  { %582 = vmatpush3.bf16.msra.mxu0 %v621_v19  ;;  %597 = vmatprep.mubr.msk.bf16.mxu0 %vm737_vm0, %v736_v0 }
  0x5a   :  { %583 = vmatprep.subr.bf16.mxu0 %v736_v0  ;;  %578 = vmatmul.mubr.bf16.vlgmr.msra.gmra.mrb[0].mxu1 %v635_v28 }
  0x5d   :  { %584 = vmatpush3.bf16.msra.mxu0 %v623_v21 }
  0x5e   :  { %585 = vmatprep.subr.bf16.mxu0 %v736_v0 }
  0x61   :  { %586 = vmatpush3.bf16.msra.mxu0 %v625_v22 }
  0x62   :  { %587 = vmatprep.subr.bf16.mxu0 %v736_v0 }
  0x65   :  { %588 = vmatpush3.bf16.msra.mxu0 %v627_v23 }
  0x66   :  { %589 = vmatprep.subr.bf16.mxu0 %v736_v0 }
  0x69   :  { %590 = vmatpush3.bf16.msra.mxu0 %v629_v24 }
  0x6a   :  { %591 = vmatprep.subr.bf16.mxu0 %v736_v0 }
  0x6d   :  { %592 = vmatpush3.bf16.msra.mxu0 %v631_v25 }
  0x6e   :  { %593 = vmatprep.subr.bf16.mxu0 %v736_v0 }
  0x71   :  { %594 = vmatpush3.bf16.msra.mxu0 %v633_v26 }
  0x72   :  { %595 = vmatprep.subr.bf16.mxu0 %v736_v0 }
  0x75   :  { %596 = vmatpush3.bf16.msra.mxu0 %v636_v29 }
  0xb9   :  { %v209_v30 = vpop.permute.xlu0 %208 }
  0xbd   :  { %v214_v33 = vpop.permute.xlu0 %213 }
 0x12b   :  { %v188_v31 = vpop.f32.mrb[0].mxu0 }
 0x12c   :  { %v559_v32 = vpop.f32.mrb[1].mxu0  ;;  %v216_v35 = vmul.f32 %v209_v30, %v188_v31 }
 0x12d   :  { %v191_v34 = vpop.f32.mrb[2].mxu0  ;;  %v341_v39 = vpop.f32.mrb[0].mxu1 }
 0x12e   :  { %v217_v36 = vmul.f32 %v214_v33, %v191_v34  ;;  %v560_v37 = vpop.f32.mrb[3].mxu0  ;;  %v579_v40 = vpop.f32.mrb[1].mxu1 }
 0x12f   :  { %v344_v41 = vpop.f32.mrb[2].mxu1 }
 0x130   :  { %v218_v38 = vpack.c.bf16 %v217_v36, %v216_v35  ;;  %v580_v42 = vpop.f32.mrb[3].mxu1 }
 0x132   :  { %598 = vmatmul.mubr.bf16.vlgmr.msra.gmra.mrb[4].mxu0 %v218_v38 }
 0x205   :  { %v430_v43 = vpop.f32.mrb[4].mxu0 }
 0x206   :  { %v431_v45 = vadd.f32 %v430_v43, %v341_v39  ;;  %v599_v46 = vpop.f32.mrb[5].mxu0 }
 0x207   :  { %v433_v47 = vpop.f32.mrb[6].mxu0 }
 0x208   :  { %v444_v48 = vadd.f32 %v504_v44, %v431_v45  ;;  %v434_v49 = vadd.f32 %v433_v47, %v344_v41  ;;  %v600_v50 = vpop.f32.mrb[7].mxu0 }
 0x20a   :  { %v445_v51 = vadd.f32 %v504_v44, %v434_v49  ;;  %v446_v52 = vmax.f32 %v444_v48, 0.0 }
 0x20c   :  { %v447_v53 = vmax.f32 %v445_v51, 0.0 }
 0x20e   :  { %v512_v54 = vpack.c.bf16 %v447_v53, %v446_v52 }
 0x210   :  { %513 = vst [vmem:[#allocation9] sm:$0xff] %v512_v54  }
 0x211   :  { %714 = shalt.err (!%p711_p0)
}
 0x212   :  { %s715_s25 = scalar_lea.hbm %s899_s7, 128 }
 0x213   :  { %p716_p1 = scmp.ne.s32.totalorder %s899_s7, %s715_s25  ;;  %p719_p2 = scmp.lt.u32.totalorder %s715_s25, %s899_s7 }
 0x215   :  { %p721_p3 = pnand %p719_p2, %p716_p1 }
 0x217   :  { %724 = shalt.err (!%p721_p3)
}
 0x218   :  { %469 = dma.vmem_to_hbm [thread:$0]  %s464_s23, 128, %s899_s7, [#allocation5], %s733_s13, %s733_s13, %s734_s14  }
 0x219   :  { %729 = dma.done.wait [#allocation5], 128  }
 0x21a   :  { %730 = vsyncadd [#allocation5], 4294967168 }
 0x21b   :  { %473 = vsyncpa [#allocation4], 1 }
 0x21c   :  { %474 = vsyncpa [#allocation7], 1 }
 0x21d   :  { %475 = vsyncpa [#allocation5], 1 }

</bundles_post_ra>
